<compile_context>
chip_gen: v5e
topology: v5e:2x2
jax: 0.10.0
libtpu: 0.0.40
codegen_flags: <defaults>
</compile_context>

<pallas_src>
import functools

import jax
import jax.numpy as jnp
from jax.experimental import pallas as pl
from jax.experimental.pallas import tpu as pltpu

HIDDEN = 64
LANE = 128


def _ceil_div(a: int, b: int) -> int:
    return -(-a // b)


def _round_up(x: int, m: int) -> int:
    return _ceil_div(x, m) * m


def critic_kernel(obs_t_ref, w1t_ref, w2t_ref, pvec_ref, out_ref, *, compute_dtype):
    """Fused Critic MLP forward for one batch tile, batch on the lane axis.

    obs_t_ref : (num_obs, TB) f32   observations, transposed (batch on lanes)
    w1t_ref   : (64, num_obs) f32   PyTorch Linear weight layout (out, in)
    w2t_ref   : (64, 64)      f32
    pvec_ref  : (64, 4)       f32   cols: b1 | b2 | w3 | [b3, 0, ..., 0]
    out_ref   : (1, TB)       f32   values, batch on lanes (lane-dense store)
    """
    x = obs_t_ref[...]                      # (num_obs, TB)
    b1 = pvec_ref[:, 0:1]                   # (64, 1)
    b2 = pvec_ref[:, 1:2]                   # (64, 1)
    w3 = pvec_ref[:, 2:3]                   # (64, 1)
    b3 = pvec_ref[0:1, 3:4]                 # (1, 1)

    # Layer 1: h1 = tanh(W1 @ x + b1)                                    (64, TB)
    z1 = jnp.dot(w1t_ref[...], x, preferred_element_type=jnp.float32) + b1
    h1 = jnp.tanh(z1.astype(compute_dtype))

    # Layer 2: h2 = tanh(W2 @ h1 + b2)                                   (64, TB)
    z2 = jnp.dot(w2t_ref[...].astype(h1.dtype), h1,
                 preferred_element_type=jnp.float32) + b2
    h2 = jnp.tanh(z2.astype(compute_dtype))

    # Layer 3 (64 -> 1): VPU multiply + sublane reduce, no N=1 MXU pass.  (1, TB)
    v = jnp.sum(h2.astype(jnp.float32) * w3, axis=0, keepdims=True) + b3
    out_ref[...] = v.astype(out_ref.dtype)


def critic_forward_tb(obs_t, params, *, batch_tile=8192, compute_dtype=jnp.float32):
    """Fast path.  obs_t: (num_obs, B) float32 (batch already on lanes) -> (B, 1)."""
    num_obs, B = obs_t.shape
    obs_t = obs_t.astype(jnp.float32)

    # Lane-aligned batch tile, no bigger than the (rounded-up) batch.
    tb = min(_round_up(batch_tile, LANE), _round_up(B, LANE))
    # Guarantee >= 2 grid steps whenever there is enough work so both TensorCores on
    # v7x get a shard ("parallel" grid axes are distributed across cores).
    if _round_up(B, LANE) >= 2 * LANE:
        tb = min(tb, _round_up(_ceil_div(_round_up(B, LANE), 2), LANE))
    # Ragged last block: no wrapper-side padding; Pallas masks OOB output lanes.
    grid = (_ceil_div(B, tb),)

    kernel = functools.partial(critic_kernel, compute_dtype=compute_dtype)

    out = pl.pallas_call(
        kernel,
        out_shape=jax.ShapeDtypeStruct((1, B), jnp.float32),
        grid_spec=pltpu.PrefetchScalarGridSpec(
            num_scalar_prefetch=0,
            grid=grid,
            in_specs=[
                pl.BlockSpec((num_obs, tb), lambda i: (0, i)),      # obs tile (lane-dense)
                # Weight blocks: constant (0, 0) block index -> grid-invariant, stay
                # resident in VMEM instead of being re-DMA'd each grid step.
                pl.BlockSpec((HIDDEN, num_obs), lambda i: (0, 0)),  # w1t
                pl.BlockSpec((HIDDEN, HIDDEN), lambda i: (0, 0)),   # w2t
                pl.BlockSpec((HIDDEN, 4), lambda i: (0, 0)),        # b1|b2|w3|b3 packed
            ],
            out_specs=pl.BlockSpec((1, tb), lambda i: (0, i)),      # lane-dense output
        ),
        compiler_params=pltpu.CompilerParams(
            # TODO(synk): on v7x, confirm both TensorCores run in xprof; if not, switch
            # to pltpu.CORE_PARALLEL / an explicit core_map.
            dimension_semantics=("parallel",),
        ),
    )(obs_t, params["w1t"], params["w2t"], params["pvec"])

    return out.reshape(B, 1)


def critic_forward(obs, params, *, batch_tile=8192, compute_dtype=jnp.float32):
    """Module-semantics wrapper: obs (B, num_obs) -> value (B, 1).

    Prefer `critic_forward_tb` with obs already produced in (num_obs, B) layout: for
    this memory-light MLP the XLA transpose here costs about as much HBM traffic as
    the kernel itself.
    """
    return critic_forward_tb(obs.T, params, batch_tile=batch_tile,
                             compute_dtype=compute_dtype)


def init_critic_params(key, num_obs):
    """Mirror layer_init: orthogonal weights (std sqrt(2), sqrt(2), 1.0), zero biases.
    Weights kept in PyTorch (out, in) layout; small params packed into one block."""
    k1, k2, k3 = jax.random.split(key, 3)
    ortho = jax.nn.initializers.orthogonal

    w1 = ortho(scale=2.0 ** 0.5)(k1, (HIDDEN, num_obs), jnp.float32)  # (64, num_obs)
    w2 = ortho(scale=2.0 ** 0.5)(k2, (HIDDEN, HIDDEN), jnp.float32)   # (64, 64)
    w3 = ortho(scale=1.0)(k3, (1, HIDDEN), jnp.float32)               # (1, 64)

    pvec = jnp.zeros((HIDDEN, 4), jnp.float32)    # cols: b1 | b2 | w3 | [b3, 0...]
    pvec = pvec.at[:, 2].set(w3[0])
    return {"w1t": w1, "w2t": w2, "pvec": pvec}


def critic_reference(obs, params):
    """Pure-JAX reference (standard batch-major math) for correctness checking."""
    b1 = params["pvec"][:, 0]
    b2 = params["pvec"][:, 1]
    w3 = params["pvec"][:, 2]
    b3 = params["pvec"][0, 3]
    h1 = jnp.tanh(obs @ params["w1t"].T + b1)
    h2 = jnp.tanh(h1 @ params["w2t"].T + b2)
    return h2 @ w3[:, None] + b3


if __name__ == "__main__":
    key = jax.random.PRNGKey(0)
    k_obs, k_obs2, k_bias, k_params = jax.random.split(key, 4)

    # Small shapes consistent with the module (CartPole-like num_obs).
    batch, num_obs = 16, 8
    obs = jax.random.normal(k_obs, (batch, num_obs), dtype=jnp.float32)
    params = init_critic_params(k_params, num_obs)

    # 1) Module-semantics path, single grid step, zero biases (exactly layer_init).
    value = jax.block_until_ready(critic_forward(obs, params))
    ref = critic_reference(obs, params)
    assert value.shape == (batch, 1)
    assert jnp.allclose(value, ref, atol=2e-5, rtol=1e-5), "mismatch vs reference (small)"

    # 2) Transposed fast path, batch not a multiple of the tile (ragged final block,
    #    multi-step "parallel" grid), non-zero biases to exercise the bias path.
    batch2 = 300
    params2 = dict(params)
    params2["pvec"] = params["pvec"] + 0.05 * jax.random.normal(
        k_bias, params["pvec"].shape, dtype=jnp.float32)
    obs2 = jax.random.normal(k_obs2, (batch2, num_obs), dtype=jnp.float32)
    obs2_t = obs2.T  # producer hands over (num_obs, B): no wrapper transpose / pad
    value2 = jax.block_until_ready(critic_forward_tb(obs2_t, params2))
    ref2 = critic_reference(obs2, params2)
    assert value2.shape == (batch2, 1)
    assert jnp.allclose(value2, ref2, atol=2e-5, rtol=1e-5), "mismatch vs reference (ragged)"

    # 3) Optional bf16-tanh path (v6e/v7x EUP is bf16-capable) -- looser tolerance.
    value3 = jax.block_until_ready(
        critic_forward_tb(obs2_t, params2, compute_dtype=jnp.bfloat16))
    assert value3.shape == (batch2, 1)
    assert jnp.allclose(value3, ref2, atol=5e-2, rtol=0.0), "mismatch vs reference (bf16)"

    print("KERNEL_OK")
</pallas_src>

<mosaic_0001>
module attributes {stable_mosaic.version = 11 : i64} {
  func.func @critic_kernel(%arg0: i32, %arg1: memref<8x128xf32, #tpu.memory_space<vmem>>, %arg2: memref<64x8xf32, #tpu.memory_space<vmem>>, %arg3: memref<64x64xf32, #tpu.memory_space<vmem>>, %arg4: memref<64x4xf32, #tpu.memory_space<vmem>>, %arg5: memref<1x128xf32, #tpu.memory_space<vmem>>) attributes {dimension_semantics = [#tpu.dimension_semantics<parallel>], iteration_bounds = array<i64: 1>, scalar_prefetch = 0 : i64, scratch_operands = 0 : i64, tpu.core_type = #tpu.core_type<tc>, window_params = [{transform_indices = @transform_0, window_bounds = array<i64: 8, 128>}, {pipeline_mode = #tpu.pipeline_mode<synchronous>, transform_indices = @transform_1, window_bounds = array<i64: 64, 8>}, {pipeline_mode = #tpu.pipeline_mode<synchronous>, transform_indices = @transform_2, window_bounds = array<i64: 64, 64>}, {pipeline_mode = #tpu.pipeline_mode<synchronous>, transform_indices = @transform_3, window_bounds = array<i64: 64, 4>}, {transform_indices = @transform_4, window_bounds = array<i64: 1, 128>}]} {
    %c0 = arith.constant 0 : index
    %c0_0 = arith.constant 0 : index
    %0 = vector.load %arg1[%c0, %c0_0] : memref<8x128xf32, #tpu.memory_space<vmem>>, vector<8x128xf32>
    %c0_1 = arith.constant 0 : index
    %c0_2 = arith.constant 0 : index
    %1 = vector.load %arg4[%c0_1, %c0_2] : memref<64x4xf32, #tpu.memory_space<vmem>>, vector<64x1xf32>
    %c0_3 = arith.constant 0 : index
    %c1 = arith.constant 1 : index
    %2 = vector.load %arg4[%c0_3, %c1] : memref<64x4xf32, #tpu.memory_space<vmem>>, vector<64x1xf32>
    %c0_4 = arith.constant 0 : index
    %c2 = arith.constant 2 : index
    %3 = vector.load %arg4[%c0_4, %c2] : memref<64x4xf32, #tpu.memory_space<vmem>>, vector<64x1xf32>
    %c0_5 = arith.constant 0 : index
    %c3 = arith.constant 3 : index
    %4 = vector.load %arg4[%c0_5, %c3] : memref<64x4xf32, #tpu.memory_space<vmem>>, vector<1x1xf32>
    %c0_6 = arith.constant 0 : index
    %c0_7 = arith.constant 0 : index
    %5 = vector.load %arg2[%c0_6, %c0_7] : memref<64x8xf32, #tpu.memory_space<vmem>>, vector<64x8xf32>
    %cst = arith.constant dense<0.000000e+00> : vector<64x128xf32>
    %6 = tpu.matmul %5, %0, %cst {dimension_numbers = #tpu.dot_dimension_numbers<[1], [0], [0], [1], [0, 0, 1, 1], [], []>} : vector<64x8xf32>, vector<8x128xf32>, vector<64x128xf32> -> vector<64x128xf32>
    %7 = vector.broadcast %1 : vector<64x1xf32> to vector<64x128xf32>
    %8 = arith.addf %6, %7 : vector<64x128xf32>
    %9 = math.tanh %8 : vector<64x128xf32>
    %c0_8 = arith.constant 0 : index
    %c0_9 = arith.constant 0 : index
    %10 = vector.load %arg3[%c0_8, %c0_9] : memref<64x64xf32, #tpu.memory_space<vmem>>, vector<64x64xf32>
    %cst_10 = arith.constant dense<0.000000e+00> : vector<64x128xf32>
    %11 = tpu.matmul %10, %9, %cst_10 {dimension_numbers = #tpu.dot_dimension_numbers<[1], [0], [0], [1], [0, 0, 1, 1], [], []>} : vector<64x64xf32>, vector<64x128xf32>, vector<64x128xf32> -> vector<64x128xf32>
    %12 = vector.broadcast %2 : vector<64x1xf32> to vector<64x128xf32>
    %13 = arith.addf %11, %12 : vector<64x128xf32>
    %14 = math.tanh %13 : vector<64x128xf32>
    %15 = vector.broadcast %3 : vector<64x1xf32> to vector<64x128xf32>
    %16 = arith.mulf %14, %15 : vector<64x128xf32>
    %cst_11 = arith.constant dense<0.000000e+00> : vector<128xf32>
    %17 = vector.multi_reduction <add>, %16, %cst_11 [0] : vector<64x128xf32> to vector<128xf32>
    %18 = vector.shape_cast %17 : vector<128xf32> to vector<1x128xf32>
    %19 = vector.broadcast %4 : vector<1x1xf32> to vector<1x128xf32>
    %20 = arith.addf %18, %19 : vector<1x128xf32>
    %c0_12 = arith.constant 0 : index
    %c0_13 = arith.constant 0 : index
    %21 = vector.load %arg5[%c0_12, %c0_13] : memref<1x128xf32, #tpu.memory_space<vmem>>, vector<1x128xf32>
    tpu.vector_store %arg5[%c0_12, %c0_13], %20 {strides = array<i32>} : memref<1x128xf32, #tpu.memory_space<vmem>>, vector<1x128xf32>,
    return
  }
  func.func @transform_0(%arg0: i32) -> (i32, i32) {
    %c0_i32 = arith.constant 0 : i32
    %c0_i32_0 = arith.constant 0 : i32
    return %c0_i32, %arg0 : i32, i32
  }
  func.func @transform_1(%arg0: i32) -> (i32, i32) {
    %c0_i32 = arith.constant 0 : i32
    %c0_i32_0 = arith.constant 0 : i32
    %c0_i32_1 = arith.constant 0 : i32
    return %c0_i32, %c0_i32_0 : i32, i32
  }
  func.func @transform_2(%arg0: i32) -> (i32, i32) {
    %c0_i32 = arith.constant 0 : i32
    %c0_i32_0 = arith.constant 0 : i32
    %c0_i32_1 = arith.constant 0 : i32
    return %c0_i32, %c0_i32_0 : i32, i32
  }
  func.func @transform_3(%arg0: i32) -> (i32, i32) {
    %c0_i32 = arith.constant 0 : i32
    %c0_i32_0 = arith.constant 0 : i32
    %c0_i32_1 = arith.constant 0 : i32
    return %c0_i32, %c0_i32_0 : i32, i32
  }
  func.func @transform_4(%arg0: i32) -> (i32, i32) {
    %c0_i32 = arith.constant 0 : i32
    %c0_i32_0 = arith.constant 0 : i32
    return %c0_i32, %arg0 : i32, i32
  }
}

</mosaic_0001>

<bundles_post_ra>
// kernel: tpu_custom_call.1
= control target key start
LH: loop header
LB: loop body
LE: loop exit
PB: predicated region body
PF: predicated region fallthrough
CT: control target
= control target key end

     0   :  { %vm76_vm0 = vcmask 64512   ;;  %v447_v3 = vmov 0   ;;  %s594_s0 = inlined_call_operand.vmem [shape: f32[8,16], index: 0, kind: input, shape index: {}]   ;;  %s595_s1 = inlined_call_operand.vmem [shape: f32[64,8], index: 1, kind: input, shape index: {}]   ;;  %s596_s2 = inlined_call_operand.vmem [shape: f32[64,64], index: 2, kind: input, shape index: {}]   ;;  %s597_s3 = inlined_call_operand.vmem [shape: f32[64,4], index: 3, kind: input, shape index: {}]   ;;  %s598_s4 = inlined_call_operand.hbm [shape: f32[1,16], index: 4, kind: output, shape index: {}]  }
   0x1   :  { %v18_v0 = vld [vmem:[%s594_s0] sm:$0xff]  ;;  %v483_v1 = vld [vmem:[%s597_s3 + $0x28] sm:$0xff]  ;;  %379 = vset.pattern.permute.xlu1 %v447_v3  ;;  %v495_v5 = vld [vmem:[%s597_s3 + $0x38] sm:$0xff]  ;;  %378 = vset.pattern.permute.xlu0 %v447_v3 }
   0x2   :  { %v28_v2 = vld [vmem:[%s595_s1] sm:$0xff]  ;;  %116 = vmatpush.msra.mxu0 %v18_v0  ;;  %v33_v4 = vld [vmem:[%s595_s1 + $0x28] sm:$0xff]  ;;  %356 = vmatpush.msra.mxu3 %v18_v0  ;;  %v22_v6 = vld [vmem:[%s597_s3 + $0x18] sm:$0xff] }
   0x3   :  { %63 = vperm.xlu1 %379, %v483_v1   ;;  %340 = vmatmul.msk.f32.vlgmr.msra.gmra.mxu0 %vm76_vm0, %v28_v2 }
   0x4   :  { %345 = vmatmul.msk.f32.vlgmr.msra.gmra.mxu3 %vm76_vm0, %v33_v4  ;;  %380 = vset.pattern.permute.xlu2 %v447_v3 }
   0x5   :  { %73 = vperm.xlu0 %378, %v495_v5  }
   0x6   :  { %9 = vsyncpa [#allocation3], 0  ;;  %53 = vperm.xlu2 %380, %v22_v6   ;;  %v506_v7 = vld [vmem:[%s597_s3 + $0x20] sm:$0xff]  ;;  %v29_v8 = vld [vmem:[%s595_s1 + $0x8] sm:$0xff]  ;;  %v448_v19 = vmov 1   ;;  %v449_v27 = vmov 2  }
   0x7   :  { %v34_v9 = vld [vmem:[%s595_s1 + $0x30] sm:$0xff]  ;;  %v19_v12 = vld [vmem:[%s597_s3] sm:$0xff]  ;;  %v35_v14 = vld [vmem:[%s595_s1 + $0x38] sm:$0xff]  ;;  %vm190_vm1 = vcmask 523264   ;;  %v450_v59 = vmov 3   ;;  %s331_s14 = sshll.u32 %s598_s4, 4  ;;  %s332_s14 = int_to_ptr.hbm [resolvable:$true] %s331_s14 }
   0x8   :  { %v518_v10 = vld [vmem:[%s597_s3 + $0x30] sm:$0xff]  ;;  %v20_v15 = vld [vmem:[%s597_s3 + $0x8] sm:$0xff]  ;;  %v31_v16 = vld [vmem:[%s595_s1 + $0x18] sm:$0xff] }
   0x9   :  { %v21_v11 = vld [vmem:[%s597_s3 + $0x10] sm:$0xff]  ;;  %v32_v17 = vld [vmem:[%s595_s1 + $0x20] sm:$0xff]  ;;  %v153_v53 = vld [vmem:[%s596_s2 + $0x18] sm:$0xff] }
   0xa   :  { %v30_v13 = vld [vmem:[%s595_s1 + $0x10] sm:$0xff]  ;;  %v150_v51 = vld [vmem:[%s596_s2] sm:$0xff]  ;;  %v157_v54 = vld [vmem:[%s596_s2 + $0x38] sm:$0xff] }
   0xb   :  { %58 = vperm.xlu1 %379, %v506_v7   ;;  %341 = vmatmul.msk.f32.gmra.mxu0 %vm76_vm0, %v29_v8  ;;  %v151_v55 = vld [vmem:[%s596_s2 + $0x8] sm:$0xff]  ;;  %v154_v56 = vld [vmem:[%s596_s2 + $0x20] sm:$0xff]  ;;  %v152_v58 = vld [vmem:[%s596_s2 + $0x10] sm:$0xff] }
   0xc   :  { %346 = vmatmul.msk.f32.gmra.mxu3 %vm76_vm0, %v34_v9  ;;  %v27_v57 = vld [vmem:[%s597_s3] sm:$0x1]  ;;  %v155_v60 = vld [vmem:[%s596_s2 + $0x28] sm:$0xff]  ;;  %v156_v61 = vld [vmem:[%s596_s2 + $0x30] sm:$0xff]  ;;  %s451_s2 = smov [#allocation2]  }
   0xd   :  { %68 = vperm.xlu0 %378, %v518_v10   ;;  %s329_s3 = sshll.u32 %s451_s2, 4  ;;  %s330_s3 = int_to_ptr.vmem [resolvable:$true] %s329_s3 }
   0xe   :  { %48 = vperm.xlu2 %380, %v21_v11  }
  0x13   :  { %38 = vperm.xlu1 %379, %v19_v12   ;;  %342 = vmatmul.msk.f32.gmra.mxu0 %vm76_vm0, %v30_v13 }
  0x14   :  { %347 = vmatmul.msk.f32.gmra.mxu3 %vm76_vm0, %v35_v14 }
  0x15   :  { %43 = vperm.xlu0 %378, %v20_v15  }
  0x16   :  { %381 = vset.pattern.permute.xlu2 %v448_v19 }
  0x17   :  { %159 = vperm.xlu2 %381, %v19_v12  }
  0x1b   :  { %343 = vmatmul.msk.f32.gmra.mxu0 %vm76_vm0, %v31_v16  ;;  %383 = vset.pattern.permute.xlu1 %v448_v19 }
  0x1c   :  { %167 = vperm.xlu1 %383, %v21_v11  }
  0x1d   :  { %382 = vset.pattern.permute.xlu0 %v448_v19 }
  0x1e   :  { %163 = vperm.xlu0 %382, %v20_v15  }
  0x1f   :  { %171 = vperm.xlu2 %381, %v22_v6  }
  0x23   :  { %344 = vmatmul.msk.f32.gmra.mxu0 %vm76_vm0, %v32_v17 }
  0x24   :  { %175 = vperm.xlu1 %383, %v506_v7  }
  0x26   :  { %384 = vset.pattern.permute.xlu0 %v449_v27 }
  0x27   :  { %179 = vperm.xlu2 %381, %v483_v1   ;;  %265 = vperm.xlu0 %384, %v19_v12  }
  0x2c   :  { %385 = vset.pattern.permute.xlu1 %v449_v27 }
  0x2d   :  { %269 = vperm.xlu1 %385, %v20_v15  }
  0x2f   :  { %183 = vperm.xlu2 %381, %v518_v10   ;;  %277 = vperm.xlu0 %384, %v22_v6  }
  0x35   :  { %273 = vperm.xlu1 %385, %v21_v11  }
  0x37   :  { %187 = vperm.xlu2 %381, %v495_v5   ;;  %289 = vperm.xlu0 %384, %v518_v10  }
  0x3d   :  { %281 = vperm.xlu1 %385, %v506_v7  }
  0x3f   :  { %386 = vset.pattern.permute.xlu2 %v449_v27  ;;  %388 = vset.pattern.permute.xlu0 %v450_v59 }
  0x40   :  { %285 = vperm.xlu2 %386, %v483_v1  }
  0x45   :  { %293 = vperm.xlu1 %385, %v495_v5  }
  0x48   :  { %387 = vset.pattern.permute.xlu2 %v450_v59 }
  0x49   :  { %319 = vperm.xlu2 %387, %v27_v57  }
  0x60   :  { %v54_v26 = vpop.permute.xlu2 %53 }
  0x68   :  { %v49_v36 = vpop.permute.xlu2 %48 }
  0x71   :  { %v160_v62 = vpop.permute.xlu2 %159 }
  0x75   :  { %v64_v24 = vpop.permute.xlu1 %63 }
  0x77   :  { %v74_v22 = vpop.permute.xlu0 %73 }
  0x79   :  { %v172_v0 = vpop.permute.xlu2 %171 }
  0x7d   :  { %v59_v34 = vpop.permute.xlu1 %58 }
  0x7f   :  { %v69_v28 = vpop.permute.xlu0 %68 }
  0x80   :  { %v118_v18 = vpop.f32.mrf.mxu0 }
  0x81   :  { %v180_v3 = vpop.permute.xlu2 %179 }
  0x85   :  { %v39_v44 = vpop.permute.xlu1 %38 }
  0x86   :  { %v119_v46 = vadd.f32 %v118_v18, %v39_v44 }
  0x87   :  { %v133_v20 = vpop.f32.mrf.mxu3  ;;  %v44_v41 = vpop.permute.xlu0 %43 }
  0x88   :  { %v121_v21 = vpop.f32.mrf.mxu0  ;;  %v134_v33 = vadd.f32 %v133_v20, %v64_v24 }
  0x89   :  { %v122_v45 = vadd.f32 %v121_v21, %v44_v41  ;;  %v184_v11 = vpop.permute.xlu2 %183 }
  0x8e   :  { %v168_v63 = vpop.permute.xlu1 %167 }
  0x8f   :  { %v136_v23 = vpop.f32.mrf.mxu3 }
  0x90   :  { %v124_v25 = vpop.f32.mrf.mxu0  ;;  %v137_v30 = vadd.f32 %v136_v23, %v69_v28  ;;  %v164_v5 = vpop.permute.xlu0 %163 }
  0x91   :  { %v125_v43 = vadd.f32 %v124_v25, %v49_v36  ;;  %v188_v25 = vpop.permute.xlu2 %187 }
  0x96   :  { %v176_v1 = vpop.permute.xlu1 %175 }
  0x97   :  { %v139_v29 = vpop.f32.mrf.mxu3 }
  0x98   :  { %v140_v31 = vadd.f32 %v139_v29, %v74_v22  ;;  %v127_v32 = vpop.f32.mrf.mxu0 }
  0x99   :  { %v128_v39 = vadd.f32 %v127_v32, %v54_v26  ;;  %v266_v15 = vpop.permute.xlu0 %265 }
  0x9a   :  { %389 = vtanh.f32 %v140_v31 }
  0x9b   :  { %391 = vtanh.f32 %v137_v30 }
  0x9c   :  { %393 = vtanh.f32 %v134_v33 }
  0x9f   :  { %v270_v7 = vpop.permute.xlu1 %269 }
  0xa0   :  { %v390_v35 = vpop.eup %389  ;;  %v130_v37 = vpop.f32.mrf.mxu0 }
  0xa1   :  { %223 = vmatpush.msra.mxu1 %v390_v35  ;;  %357 = vmatpush.msra.mxu2 %v390_v35  ;;  %v392_v38 = vpop.eup %391  ;;  %v131_v40 = vadd.f32 %v130_v37, %v59_v34  ;;  %v278_v30 = vpop.permute.xlu0 %277 }
  0xa2   :  { %358 = vmatpush.msrb.mxu3 %v390_v35  ;;  %v394_v42 = vpop.eup %393 }
  0xa3   :  { %224 = vmatpush.msra.mxu1 %v392_v38  ;;  %359 = vmatpush.msra.mxu2 %v392_v38  ;;  %395 = vtanh.f32 %v131_v40  ;;  %v286_v40 = vpop.permute.xlu2 %285 }
  0xa4   :  { %360 = vmatpush.msrb.mxu3 %v392_v38  ;;  %397 = vtanh.f32 %v128_v39 }
  0xa5   :  { %225 = vmatpush.msra.mxu1 %v394_v42  ;;  %361 = vmatpush.msra.mxu2 %v394_v42  ;;  %399 = vtanh.f32 %v125_v43 }
  0xa6   :  { %362 = vmatpush.msrb.mxu3 %v394_v42  ;;  %401 = vtanh.f32 %v122_v45 }
  0xa7   :  { %403 = vtanh.f32 %v119_v46  ;;  %v274_v17 = vpop.permute.xlu1 %273 }
  0xa9   :  { %v396_v47 = vpop.eup %395 }
  0xaa   :  { %226 = vmatpush.msra.mxu1 %v396_v47  ;;  %363 = vmatpush.msra.mxu2 %v396_v47  ;;  %v398_v48 = vpop.eup %397 }
  0xab   :  { %364 = vmatpush.msrb.mxu3 %v396_v47  ;;  %v400_v49 = vpop.eup %399  ;;  %v290_v47 = vpop.permute.xlu0 %289 }
  0xac   :  { %227 = vmatpush.msra.mxu1 %v398_v48  ;;  %365 = vmatpush.msra.mxu2 %v398_v48  ;;  %v402_v50 = vpop.eup %401 }
  0xad   :  { %366 = vmatpush.msrb.mxu3 %v398_v48  ;;  %v404_v52 = vpop.eup %403 }
  0xae   :  { %228 = vmatpush.msra.mxu1 %v400_v49  ;;  %367 = vmatpush.msra.mxu2 %v400_v49 }
  0xaf   :  { %368 = vmatpush.msrb.mxu3 %v400_v49  ;;  %v282_v33 = vpop.permute.xlu1 %281 }
  0xb0   :  { %229 = vmatpush.msra.mxu1 %v402_v50  ;;  %369 = vmatpush.msra.mxu2 %v402_v50 }
  0xb1   :  { %370 = vmatpush.msrb.mxu3 %v402_v50 }
  0xb2   :  { %230 = vmatpush.msra.mxu1 %v404_v52  ;;  %371 = vmatpush.msra.mxu2 %v404_v52 }
  0xb3   :  { %372 = vmatpush.msrb.mxu3 %v404_v52  ;;  %348 = vmatmul.msk.f32.vlgmr.msra.gmra.mxu1 %vm190_vm1, %v150_v51 }
  0xb4   :  { %351 = vmatmul.msk.f32.vlgmr.msra.gmra.mxu2 %vm190_vm1, %v153_v53  ;;  %355 = vmatmul.msk.f32.vlgmr.msrb.gmra.mxu3 %vm190_vm1, %v157_v54 }
  0xb7   :  { %v294_v46 = vpop.permute.xlu1 %293 }
  0xbb   :  { %349 = vmatmul.msk.f32.gmra.mxu1 %vm190_vm1, %v151_v55 }
  0xbc   :  { %352 = vmatmul.msk.f32.gmra.mxu2 %vm190_vm1, %v154_v56 }
  0xc3   :  { %350 = vmatmul.msk.f32.gmra.mxu1 %vm190_vm1, %v152_v58  ;;  %v320_v58 = vpop.permute.xlu2 %319 }
  0xc4   :  { %353 = vmatmul.msk.f32.gmra.mxu2 %vm190_vm1, %v155_v60 }
  0xcc   :  { %354 = vmatmul.msk.f32.gmra.mxu2 %vm190_vm1, %v156_v61 }
 0x130   :  { %v232_v2 = vpop.f32.mrf.mxu1 }
 0x131   :  { %v233_v9 = vadd.f32 %v232_v2, %v160_v62 }
 0x137   :  { %v241_v4 = vpop.f32.mrf.mxu2  ;;  %v253_v26 = vpop.f32.mrf.mxu3 }
 0x138   :  { %v235_v6 = vpop.f32.mrf.mxu1  ;;  %v242_v14 = vadd.f32 %v241_v4, %v172_v0  ;;  %v254_v31 = vadd.f32 %v253_v26, %v188_v25 }
 0x139   :  { %v236_v8 = vadd.f32 %v235_v6, %v164_v5 }
 0x13b   :  { %405 = vtanh.f32 %v236_v8 }
 0x13c   :  { %407 = vtanh.f32 %v233_v9 }
 0x13f   :  { %v244_v10 = vpop.f32.mrf.mxu2 }
 0x140   :  { %v238_v12 = vpop.f32.mrf.mxu1  ;;  %v245_v19 = vadd.f32 %v244_v10, %v176_v1 }
 0x141   :  { %v239_v13 = vadd.f32 %v238_v12, %v168_v63  ;;  %v406_v16 = vpop.eup %405 }
 0x142   :  { %v408_v18 = vpop.eup %407  ;;  %v297_v20 = vmul.f32 %v406_v16, %v270_v7 }
 0x143   :  { %409 = vtanh.f32 %v239_v13  ;;  %v296_v24 = vmul.f32 %v408_v18, %v266_v15 }
 0x144   :  { %411 = vtanh.f32 %v242_v14 }
 0x145   :  { %413 = vtanh.f32 %v245_v19  ;;  %v304_v28 = vadd.f32 %v297_v20, %v296_v24 }
 0x147   :  { %v247_v21 = vpop.f32.mrf.mxu2 }
 0x148   :  { %v248_v22 = vadd.f32 %v247_v21, %v180_v3 }
 0x149   :  { %v410_v23 = vpop.eup %409 }
 0x14a   :  { %v298_v27 = vmul.f32 %v410_v23, %v274_v17  ;;  %v412_v29 = vpop.eup %411  ;;  %415 = vtanh.f32 %v248_v22 }
 0x14b   :  { %v299_v34 = vmul.f32 %v412_v29, %v278_v30  ;;  %v414_v36 = vpop.eup %413  ;;  %417 = vtanh.f32 %v254_v31 }
 0x14c   :  { %v305_v32 = vadd.f32 %v304_v28, %v298_v27  ;;  %v300_v41 = vmul.f32 %v414_v36, %v282_v33 }
 0x14e   :  { %v306_v38 = vadd.f32 %v305_v32, %v299_v34 }
 0x14f   :  { %v250_v35 = vpop.f32.mrf.mxu2 }
 0x150   :  { %v251_v37 = vadd.f32 %v250_v35, %v184_v11  ;;  %v416_v39 = vpop.eup %415  ;;  %v307_v43 = vadd.f32 %v306_v38, %v300_v41 }
 0x151   :  { %v301_v42 = vmul.f32 %v416_v39, %v286_v40  ;;  %v418_v44 = vpop.eup %417 }
 0x152   :  { %419 = vtanh.f32 %v251_v37  ;;  %v303_v50 = vmul.f32 %v418_v44, %v294_v46 }
 0x153   :  { %v308_v49 = vadd.f32 %v307_v43, %v301_v42 }
 0x158   :  { %v420_v45 = vpop.eup %419 }
 0x159   :  { %v302_v48 = vmul.f32 %v420_v45, %v290_v47 }
 0x15b   :  { %v309_v51 = vadd.f32 %v308_v49, %v302_v48 }
 0x15d   :  { %v310_v52 = vadd.f32 %v309_v51, %v303_v50 }
 0x15f   :  { %v311_v53 = vrot.slane %v310_v52, 4 }
 0x161   :  { %v312_v54 = vadd.f32 %v311_v53, %v310_v52 }
 0x163   :  { %v313_v55 = vrot.slane %v312_v54, 2 }
 0x165   :  { %v314_v56 = vadd.f32 %v313_v55, %v312_v54 }
 0x167   :  { %v315_v57 = vrot.slane %v314_v56, 1 }
 0x169   :  { %v316_v59 = vadd.f32 %v315_v57, %v314_v56 }
 0x16b   :  { %v322_v60 = vadd.f32 %v320_v58, %v316_v59 }
 0x16d   :  { %323 = vst [vmem:[#allocation2] sm:$0x1] %v322_v60 }
 0x16e   :  { %334 = dma.vmem_to_hbm [thread:$0]  %s330_s3, 16, %s332_s14, [#allocation3]  }
 0x16f   :  { %445 = dma.done.wait [#allocation3], 16  }
 0x170   :  { %446 = vsyncadd [#allocation3], 4294967280 }
 0x171   :  { %339 = vsyncpa [#allocation3], 1 }

</bundles_post_ra>
